<compile_context>
chip_gen: v7x
topology: tpu7x:2x2x1
jax: 0.10.0
libtpu: 0.0.40
codegen_flags: <defaults>
</compile_context>

<pallas_src>
import functools

import jax
import jax.numpy as jnp
from jax import lax
from jax.experimental import pallas as pl
from jax.experimental.pallas import tpu as pltpu


# ----------------------------- Pallas kernel --------------------------------
def _flow_sample_kernel(
    xs_ref, w_ref, w3f_ref, b_ref, out_ref,
    *, num_t: int, A: int, S: int, H: int, o_wxs: int, o_w2: int,
):
    """Euler-integrate dx/dt = MLP(t, x, state) over t in linspace(0,1,num_t)."""
    f32 = jnp.float32
    bf16 = jnp.bfloat16
    AS = A + S

    # Loop-invariant, statically 8-row-aligned weight views (bf16, MXU side).
    wxs = w_ref[o_wxs:o_wxs + AS, :]          # [A+S, H]  = [wx ; ws]
    w2 = w_ref[o_w2:o_w2 + H, :]              # [H, H]
    w3f = w3f_ref[...]                        # [H, H+A]  = [w3*dt @ wx | w3*dt]

    # f32 bias slab (non-MXU adds stay full precision). Loaded once, hoisted.
    biases = b_ref[...]                       # [8, H] f32
    b1 = biases[0:1, :]                       # [1, H]
    b2 = biases[1:2, :]                       # [1, H]
    drift = biases[2:3, :]                    # [1, H]  dt*wt + (b3*dt)@wx
    b3tot = biases[3:4, :A]                   # [1, A]  (num_t-1)*dt*b3

    xs = xs_ref[...]                          # [Bblk, A+S]  (f32 activations)
    x0 = xs[:, :A].astype(f32)                # exact f32 copy of x(0)

    # pre1_k = x_k@wx + s@ws + b1 + t_k*wt ; at k=0 (t=0) this is xs @ [wx;ws] + b1.
    pre1 = jnp.dot(xs.astype(bf16), wxs, preferred_element_type=f32) + b1

    def body(_, carry):
        acc, pre1 = carry
        h1 = jnp.tanh(pre1).astype(bf16)
        h2 = jnp.tanh(
            jnp.dot(h1, w2, preferred_element_type=f32) + b2
        ).astype(bf16)
        upd = jnp.dot(h2, w3f, preferred_element_type=f32)      # [Bblk, H+A]
        # Critical-chain half (lane-aligned at 0): advances next step's pre-act.
        pre1 = pre1 + upd[:, :H] + drift
        # Off-chain half: accumulate dx contributions; constant bias deferred.
        acc = acc + upd[:, H:]
        return acc, pre1

    steps = num_t - 1
    acc0 = jnp.zeros((xs.shape[0], A), f32)
    unroll = True if steps <= 16 else 4
    acc, _ = lax.fori_loop(0, steps, body, (acc0, pre1), unroll=unroll)

    out_ref[...] = (x0 + acc + b3tot).astype(out_ref.dtype)


# ----------------------------- parameter packing ----------------------------
def _pack_params(params, num_t: int):
    """Fold dt / fuse the x@wx path and pack params into 3 resident slabs.

      slab_w  (bf16): [wx ; ws ; (pad to 8 rows) ; w2]        width H
      w3f     (bf16): [w3*dt @ wx | w3*dt]                     width H+A
      slab_b  (f32) : rows = b1, b2, drift, b3_total, zeros    width H
    """
    wx, ws, wt, b1, w2, b2, w3, b3 = [p.astype(jnp.float32) for p in params]
    A, H = wx.shape
    S = ws.shape[0]
    dt = jnp.float32(1.0 / (num_t - 1))
    w3d = w3 * dt                                   # [H, A]
    b3d = b3 * dt                                   # [1, A]

    # bf16 matmul-weight slabs (MXU operands, single-pass on all generations).
    o_wxs = 0
    o_w2 = ((A + S + 7) // 8) * 8
    pieces = [wx, ws]
    if o_w2 != A + S:
        pieces.append(jnp.zeros((o_w2 - (A + S), H), jnp.float32))
    pieces.append(w2)
    slab_w = jnp.concatenate(pieces, axis=0).astype(jnp.bfloat16)   # [o_w2+H, H]
    w3f = jnp.concatenate([w3d @ wx, w3d], axis=1).astype(jnp.bfloat16)  # [H, H+A]

    # f32 bias slab.
    drift = dt * wt + b3d @ wx                      # [1, H]
    b3tot_row = jnp.zeros((1, H), jnp.float32).at[:, :A].set((num_t - 1) * b3d)
    slab_b = jnp.concatenate(
        [b1, b2, drift, b3tot_row, jnp.zeros((4, H), jnp.float32)], axis=0)  # [8, H]

    return slab_w, w3f, slab_b, dict(o_wxs=o_wxs, o_w2=o_w2)


# --------------------------------- wrapper -----------------------------------
def _choose_batch_block(B: int, block_b: int):
    """Batch tiling: single block for tiny B; >=2 blocks once B is large enough
    so the 'parallel' grid axis keeps both v7x TensorCores busy."""
    if B <= 64:
        return B, B
    if B <= 2 * block_b:
        bb = ((pl.cdiv(B, 2) + 7) // 8) * 8
    else:
        bb = block_b
    Bp = pl.cdiv(B, bb) * bb
    return bb, Bp


def gmpg_policy_sample(x0, state, params, *, num_t: int = 8, block_b: int = 256):
    """GMPGPolicy.forward(state) — returns the sampled action."""
    if num_t < 2:
        raise ValueError("num_t must be >= 2 (dt = 1/(num_t-1))")

    B, A = x0.shape
    S = state.shape[1]
    H = params[0].shape[1]

    slab_w, w3f, slab_b, offsets = _pack_params(params, num_t)

    bb, Bp = _choose_batch_block(B, block_b)

    # Single [B, A+S] activation input (one DMA per batch block).
    xs = jnp.concatenate([x0.astype(jnp.float32), state.astype(jnp.float32)], axis=1)
    if Bp != B:
        xs = jnp.concatenate([xs, jnp.zeros((Bp - B, A + S), jnp.float32)], axis=0)

    kernel = functools.partial(
        _flow_sample_kernel, num_t=num_t, A=A, S=S, H=H, **offsets)

    out = pl.pallas_call(
        kernel,
        out_shape=jax.ShapeDtypeStruct((Bp, A), x0.dtype),
        grid_spec=pltpu.PrefetchScalarGridSpec(
            num_scalar_prefetch=0,
            grid=(Bp // bb,),
            in_specs=[
                pl.BlockSpec((bb, A + S), lambda i: (i, 0)),       # activations
                pl.BlockSpec(slab_w.shape, lambda i: (0, 0)),      # bf16 weights (resident)
                pl.BlockSpec(w3f.shape, lambda i: (0, 0)),         # fused update weights
                pl.BlockSpec(slab_b.shape, lambda i: (0, 0)),      # f32 biases
            ],
            out_specs=pl.BlockSpec((bb, A), lambda i: (i, 0)),
        ),
        compiler_params=pltpu.CompilerParams(
            dimension_semantics=("parallel",),
        ),
    )(xs, slab_w, w3f, slab_b)

    return out[:B] if Bp != B else out


# ----------------------------- parameter setup -------------------------------
def make_params(key, state_dim, action_dim, hidden_dim):
    """Deterministic synthetic weights for the guided (velocity) model."""
    ks = jax.random.split(key, 8)

    def lin(k, fan_in, shape):
        bound = 1.0 / jnp.sqrt(jnp.float32(fan_in))
        return jax.random.uniform(k, shape, jnp.float32, -bound, bound)

    wx = lin(ks[0], action_dim, (action_dim, hidden_dim))
    ws = lin(ks[1], state_dim, (state_dim, hidden_dim))
    wt = lin(ks[2], 1, (1, hidden_dim))
    b1 = lin(ks[3], action_dim + state_dim + 1, (1, hidden_dim))
    w2 = lin(ks[4], hidden_dim, (hidden_dim, hidden_dim))
    b2 = lin(ks[5], hidden_dim, (1, hidden_dim))
    w3 = lin(ks[6], hidden_dim, (hidden_dim, action_dim))
    b3 = lin(ks[7], hidden_dim, (1, action_dim))
    return (wx, ws, wt, b1, w2, b2, w3, b3)


# Pure-JAX f32 reference for the correctness check.
def _ref_sample(x0, state, params, num_t):
    wx, ws, wt, b1, w2, b2, w3, b3 = params
    dt = 1.0 / (num_t - 1)
    x = x0.astype(jnp.float32)
    s_proj = state.astype(jnp.float32) @ ws
    for k in range(num_t - 1):
        t = jnp.float32(k * dt)
        h1 = jnp.tanh(x @ wx + s_proj + t * wt + b1)
        h2 = jnp.tanh(h1 @ w2 + b2)
        x = x + dt * (h2 @ w3 + b3)
    return x


# ---------------------------------- main -------------------------------------
if __name__ == "__main__":
    B, S, A, H, T = 8, 32, 16, 64, 8  # batch, state_dim, action_dim, hidden, t-steps

    key = jax.random.PRNGKey(0)
    k_state, k_x0, k_params = jax.random.split(key, 3)

    state = jax.random.normal(k_state, (B, S), jnp.float32)
    # x(0) ~ N(0, I): the gaussian_generator of the flow model (glue, not kernel).
    x0 = jax.random.normal(k_x0, (B, A), jnp.float32)
    params = make_params(k_params, S, A, H)

    action = gmpg_policy_sample(x0, state, params, num_t=T)
    action = jax.block_until_ready(action)

    ref = _ref_sample(x0, state, params, T)
    assert action.shape == (B, A)
    # Tolerance covers bf16 MXU operands + the dt / x@wx fusion reassociation
    # (f32 accumulation keeps drift well inside this over 7 Euler steps).
    assert jnp.allclose(action, ref, atol=5e-2, rtol=5e-2), "mismatch vs reference"

    # TODO(synk): the full DiffusionModel / SB-flow variants (score-matching
    # losses, Hutchinson likelihoods, critic Q/V heads) are training-time paths
    # not exercised by forward(); only the ODE flow sampler is kernelized.
    print("KERNEL_OK")
</pallas_src>

<mosaic_0001>
module attributes {stable_mosaic.version = 11 : i64} {
  func.func @_flow_sample_kernel(%arg0: i32, %arg1: memref<8x48xf32, #tpu.memory_space<vmem>>, %arg2: memref<112x64xbf16, #tpu.memory_space<vmem>>, %arg3: memref<64x80xbf16, #tpu.memory_space<vmem>>, %arg4: memref<8x64xf32, #tpu.memory_space<vmem>>, %arg5: memref<8x16xf32, #tpu.memory_space<vmem>>) attributes {dimension_semantics = [#tpu.dimension_semantics<parallel>], iteration_bounds = array<i64: 1>, scalar_prefetch = 0 : i64, scratch_operands = 0 : i64, tpu.core_type = #tpu.core_type<tc>, window_params = [{transform_indices = @transform_0, window_bounds = array<i64: 8, 48>}, {pipeline_mode = #tpu.pipeline_mode<synchronous>, transform_indices = @transform_1, window_bounds = array<i64: 112, 64>}, {pipeline_mode = #tpu.pipeline_mode<synchronous>, transform_indices = @transform_2, window_bounds = array<i64: 64, 80>}, {pipeline_mode = #tpu.pipeline_mode<synchronous>, transform_indices = @transform_3, window_bounds = array<i64: 8, 64>}, {transform_indices = @transform_4, window_bounds = array<i64: 8, 16>}]} {
    %c0 = arith.constant 0 : index
    %c0_0 = arith.constant 0 : index
    %0 = vector.load %arg2[%c0, %c0_0] : memref<112x64xbf16, #tpu.memory_space<vmem>>, vector<48x64xbf16>
    %c48 = arith.constant 48 : index
    %c0_1 = arith.constant 0 : index
    %1 = vector.load %arg2[%c48, %c0_1] : memref<112x64xbf16, #tpu.memory_space<vmem>>, vector<64x64xbf16>
    %c0_2 = arith.constant 0 : index
    %c0_3 = arith.constant 0 : index
    %2 = vector.load %arg3[%c0_2, %c0_3] : memref<64x80xbf16, #tpu.memory_space<vmem>>, vector<64x80xbf16>
    %c0_4 = arith.constant 0 : index
    %c0_5 = arith.constant 0 : index
    %3 = vector.load %arg4[%c0_4, %c0_5] : memref<8x64xf32, #tpu.memory_space<vmem>>, vector<8x64xf32>
    %4 = vector.extract_strided_slice %3 {offsets = [0, 0], sizes = [1, 64], strides = [1, 1]} : vector<8x64xf32> to vector<1x64xf32>
    %5 = vector.extract_strided_slice %3 {offsets = [1, 0], sizes = [1, 64], strides = [1, 1]} : vector<8x64xf32> to vector<1x64xf32>
    %6 = vector.extract_strided_slice %3 {offsets = [2, 0], sizes = [1, 64], strides = [1, 1]} : vector<8x64xf32> to vector<1x64xf32>
    %7 = vector.extract_strided_slice %3 {offsets = [3, 0], sizes = [1, 16], strides = [1, 1]} : vector<8x64xf32> to vector<1x16xf32>
    %c0_6 = arith.constant 0 : index
    %c0_7 = arith.constant 0 : index
    %8 = vector.load %arg1[%c0_6, %c0_7] : memref<8x48xf32, #tpu.memory_space<vmem>>, vector<8x48xf32>
    %9 = vector.extract_strided_slice %8 {offsets = [0, 0], sizes = [8, 16], strides = [1, 1]} : vector<8x48xf32> to vector<8x16xf32>
    %10 = arith.truncf %8 : vector<8x48xf32> to vector<8x48xbf16>
    %cst = arith.constant dense<0.000000e+00> : vector<8x64xf32>
    %11 = tpu.matmul %10, %0, %cst {dimension_numbers = #tpu.dot_dimension_numbers<[1], [0], [0], [1], [0, 0, 1, 1], [], []>} : vector<8x48xbf16>, vector<48x64xbf16>, vector<8x64xf32> -> vector<8x64xf32>
    %12 = vector.broadcast %4 : vector<1x64xf32> to vector<8x64xf32>
    %13 = arith.addf %11, %12 : vector<8x64xf32>
    %cst_8 = arith.constant 0.000000e+00 : f32
    %14 = vector.broadcast %cst_8 : f32 to vector<8x16xf32>
    %c0_i32 = arith.constant 0 : i32
    %15 = math.tanh %13 : vector<8x64xf32>
    %16 = arith.truncf %15 : vector<8x64xf32> to vector<8x64xbf16>
    %cst_9 = arith.constant dense<0.000000e+00> : vector<8x64xf32>
    %17 = tpu.matmul %16, %1, %cst_9 {dimension_numbers = #tpu.dot_dimension_numbers<[1], [0], [0], [1], [0, 0, 1, 1], [], []>} : vector<8x64xbf16>, vector<64x64xbf16>, vector<8x64xf32> -> vector<8x64xf32>
    %18 = vector.broadcast %5 : vector<1x64xf32> to vector<8x64xf32>
    %19 = arith.addf %17, %18 : vector<8x64xf32>
    %20 = math.tanh %19 : vector<8x64xf32>
    %21 = arith.truncf %20 : vector<8x64xf32> to vector<8x64xbf16>
    %cst_10 = arith.constant dense<0.000000e+00> : vector<8x80xf32>
    %22 = tpu.matmul %21, %2, %cst_10 {dimension_numbers = #tpu.dot_dimension_numbers<[1], [0], [0], [1], [0, 0, 1, 1], [], []>} : vector<8x64xbf16>, vector<64x80xbf16>, vector<8x80xf32> -> vector<8x80xf32>
    %23 = vector.extract_strided_slice %22 {offsets = [0, 0], sizes = [8, 64], strides = [1, 1]} : vector<8x80xf32> to vector<8x64xf32>
    %24 = arith.addf %13, %23 : vector<8x64xf32>
    %25 = vector.broadcast %6 : vector<1x64xf32> to vector<8x64xf32>
    %26 = arith.addf %24, %25 : vector<8x64xf32>
    %27 = vector.extract_strided_slice %22 {offsets = [0, 64], sizes = [8, 16], strides = [1, 1]} : vector<8x80xf32> to vector<8x16xf32>
    %28 = arith.addf %14, %27 : vector<8x16xf32>
    %c1_i32 = arith.constant 1 : i32
    %29 = math.tanh %26 : vector<8x64xf32>
    %30 = arith.truncf %29 : vector<8x64xf32> to vector<8x64xbf16>
    %cst_11 = arith.constant dense<0.000000e+00> : vector<8x64xf32>
    %31 = tpu.matmul %30, %1, %cst_11 {dimension_numbers = #tpu.dot_dimension_numbers<[1], [0], [0], [1], [0, 0, 1, 1], [], []>} : vector<8x64xbf16>, vector<64x64xbf16>, vector<8x64xf32> -> vector<8x64xf32>
    %32 = vector.broadcast %5 : vector<1x64xf32> to vector<8x64xf32>
    %33 = arith.addf %31, %32 : vector<8x64xf32>
    %34 = math.tanh %33 : vector<8x64xf32>
    %35 = arith.truncf %34 : vector<8x64xf32> to vector<8x64xbf16>
    %cst_12 = arith.constant dense<0.000000e+00> : vector<8x80xf32>
    %36 = tpu.matmul %35, %2, %cst_12 {dimension_numbers = #tpu.dot_dimension_numbers<[1], [0], [0], [1], [0, 0, 1, 1], [], []>} : vector<8x64xbf16>, vector<64x80xbf16>, vector<8x80xf32> -> vector<8x80xf32>
    %37 = vector.extract_strided_slice %36 {offsets = [0, 0], sizes = [8, 64], strides = [1, 1]} : vector<8x80xf32> to vector<8x64xf32>
    %38 = arith.addf %26, %37 : vector<8x64xf32>
    %39 = vector.broadcast %6 : vector<1x64xf32> to vector<8x64xf32>
    %40 = arith.addf %38, %39 : vector<8x64xf32>
    %41 = vector.extract_strided_slice %36 {offsets = [0, 64], sizes = [8, 16], strides = [1, 1]} : vector<8x80xf32> to vector<8x16xf32>
    %42 = arith.addf %28, %41 : vector<8x16xf32>
    %c2_i32 = arith.constant 2 : i32
    %43 = math.tanh %40 : vector<8x64xf32>
    %44 = arith.truncf %43 : vector<8x64xf32> to vector<8x64xbf16>
    %cst_13 = arith.constant dense<0.000000e+00> : vector<8x64xf32>
    %45 = tpu.matmul %44, %1, %cst_13 {dimension_numbers = #tpu.dot_dimension_numbers<[1], [0], [0], [1], [0, 0, 1, 1], [], []>} : vector<8x64xbf16>, vector<64x64xbf16>, vector<8x64xf32> -> vector<8x64xf32>
    %46 = vector.broadcast %5 : vector<1x64xf32> to vector<8x64xf32>
    %47 = arith.addf %45, %46 : vector<8x64xf32>
    %48 = math.tanh %47 : vector<8x64xf32>
    %49 = arith.truncf %48 : vector<8x64xf32> to vector<8x64xbf16>
    %cst_14 = arith.constant dense<0.000000e+00> : vector<8x80xf32>
    %50 = tpu.matmul %49, %2, %cst_14 {dimension_numbers = #tpu.dot_dimension_numbers<[1], [0], [0], [1], [0, 0, 1, 1], [], []>} : vector<8x64xbf16>, vector<64x80xbf16>, vector<8x80xf32> -> vector<8x80xf32>
    %51 = vector.extract_strided_slice %50 {offsets = [0, 0], sizes = [8, 64], strides = [1, 1]} : vector<8x80xf32> to vector<8x64xf32>
    %52 = arith.addf %40, %51 : vector<8x64xf32>
    %53 = vector.broadcast %6 : vector<1x64xf32> to vector<8x64xf32>
    %54 = arith.addf %52, %53 : vector<8x64xf32>
    %55 = vector.extract_strided_slice %50 {offsets = [0, 64], sizes = [8, 16], strides = [1, 1]} : vector<8x80xf32> to vector<8x16xf32>
    %56 = arith.addf %42, %55 : vector<8x16xf32>
    %c3_i32 = arith.constant 3 : i32
    %57 = math.tanh %54 : vector<8x64xf32>
    %58 = arith.truncf %57 : vector<8x64xf32> to vector<8x64xbf16>
    %cst_15 = arith.constant dense<0.000000e+00> : vector<8x64xf32>
    %59 = tpu.matmul %58, %1, %cst_15 {dimension_numbers = #tpu.dot_dimension_numbers<[1], [0], [0], [1], [0, 0, 1, 1], [], []>} : vector<8x64xbf16>, vector<64x64xbf16>, vector<8x64xf32> -> vector<8x64xf32>
    %60 = vector.broadcast %5 : vector<1x64xf32> to vector<8x64xf32>
    %61 = arith.addf %59, %60 : vector<8x64xf32>
    %62 = math.tanh %61 : vector<8x64xf32>
    %63 = arith.truncf %62 : vector<8x64xf32> to vector<8x64xbf16>
    %cst_16 = arith.constant dense<0.000000e+00> : vector<8x80xf32>
    %64 = tpu.matmul %63, %2, %cst_16 {dimension_numbers = #tpu.dot_dimension_numbers<[1], [0], [0], [1], [0, 0, 1, 1], [], []>} : vector<8x64xbf16>, vector<64x80xbf16>, vector<8x80xf32> -> vector<8x80xf32>
    %65 = vector.extract_strided_slice %64 {offsets = [0, 0], sizes = [8, 64], strides = [1, 1]} : vector<8x80xf32> to vector<8x64xf32>
    %66 = arith.addf %54, %65 : vector<8x64xf32>
    %67 = vector.broadcast %6 : vector<1x64xf32> to vector<8x64xf32>
    %68 = arith.addf %66, %67 : vector<8x64xf32>
    %69 = vector.extract_strided_slice %64 {offsets = [0, 64], sizes = [8, 16], strides = [1, 1]} : vector<8x80xf32> to vector<8x16xf32>
    %70 = arith.addf %56, %69 : vector<8x16xf32>
    %c4_i32 = arith.constant 4 : i32
    %71 = math.tanh %68 : vector<8x64xf32>
    %72 = arith.truncf %71 : vector<8x64xf32> to vector<8x64xbf16>
    %cst_17 = arith.constant dense<0.000000e+00> : vector<8x64xf32>
    %73 = tpu.matmul %72, %1, %cst_17 {dimension_numbers = #tpu.dot_dimension_numbers<[1], [0], [0], [1], [0, 0, 1, 1], [], []>} : vector<8x64xbf16>, vector<64x64xbf16>, vector<8x64xf32> -> vector<8x64xf32>
    %74 = vector.broadcast %5 : vector<1x64xf32> to vector<8x64xf32>
    %75 = arith.addf %73, %74 : vector<8x64xf32>
    %76 = math.tanh %75 : vector<8x64xf32>
    %77 = arith.truncf %76 : vector<8x64xf32> to vector<8x64xbf16>
    %cst_18 = arith.constant dense<0.000000e+00> : vector<8x80xf32>
    %78 = tpu.matmul %77, %2, %cst_18 {dimension_numbers = #tpu.dot_dimension_numbers<[1], [0], [0], [1], [0, 0, 1, 1], [], []>} : vector<8x64xbf16>, vector<64x80xbf16>, vector<8x80xf32> -> vector<8x80xf32>
    %79 = vector.extract_strided_slice %78 {offsets = [0, 0], sizes = [8, 64], strides = [1, 1]} : vector<8x80xf32> to vector<8x64xf32>
    %80 = arith.addf %68, %79 : vector<8x64xf32>
    %81 = vector.broadcast %6 : vector<1x64xf32> to vector<8x64xf32>
    %82 = arith.addf %80, %81 : vector<8x64xf32>
    %83 = vector.extract_strided_slice %78 {offsets = [0, 64], sizes = [8, 16], strides = [1, 1]} : vector<8x80xf32> to vector<8x16xf32>
    %84 = arith.addf %70, %83 : vector<8x16xf32>
    %c5_i32 = arith.constant 5 : i32
    %85 = math.tanh %82 : vector<8x64xf32>
    %86 = arith.truncf %85 : vector<8x64xf32> to vector<8x64xbf16>
    %cst_19 = arith.constant dense<0.000000e+00> : vector<8x64xf32>
    %87 = tpu.matmul %86, %1, %cst_19 {dimension_numbers = #tpu.dot_dimension_numbers<[1], [0], [0], [1], [0, 0, 1, 1], [], []>} : vector<8x64xbf16>, vector<64x64xbf16>, vector<8x64xf32> -> vector<8x64xf32>
    %88 = vector.broadcast %5 : vector<1x64xf32> to vector<8x64xf32>
    %89 = arith.addf %87, %88 : vector<8x64xf32>
    %90 = math.tanh %89 : vector<8x64xf32>
    %91 = arith.truncf %90 : vector<8x64xf32> to vector<8x64xbf16>
    %cst_20 = arith.constant dense<0.000000e+00> : vector<8x80xf32>
    %92 = tpu.matmul %91, %2, %cst_20 {dimension_numbers = #tpu.dot_dimension_numbers<[1], [0], [0], [1], [0, 0, 1, 1], [], []>} : vector<8x64xbf16>, vector<64x80xbf16>, vector<8x80xf32> -> vector<8x80xf32>
    %93 = vector.extract_strided_slice %92 {offsets = [0, 0], sizes = [8, 64], strides = [1, 1]} : vector<8x80xf32> to vector<8x64xf32>
    %94 = arith.addf %82, %93 : vector<8x64xf32>
    %95 = vector.broadcast %6 : vector<1x64xf32> to vector<8x64xf32>
    %96 = arith.addf %94, %95 : vector<8x64xf32>
    %97 = vector.extract_strided_slice %92 {offsets = [0, 64], sizes = [8, 16], strides = [1, 1]} : vector<8x80xf32> to vector<8x16xf32>
    %98 = arith.addf %84, %97 : vector<8x16xf32>
    %c6_i32 = arith.constant 6 : i32
    %99 = math.tanh %96 : vector<8x64xf32>
    %100 = arith.truncf %99 : vector<8x64xf32> to vector<8x64xbf16>
    %cst_21 = arith.constant dense<0.000000e+00> : vector<8x64xf32>
    %101 = tpu.matmul %100, %1, %cst_21 {dimension_numbers = #tpu.dot_dimension_numbers<[1], [0], [0], [1], [0, 0, 1, 1], [], []>} : vector<8x64xbf16>, vector<64x64xbf16>, vector<8x64xf32> -> vector<8x64xf32>
    %102 = vector.broadcast %5 : vector<1x64xf32> to vector<8x64xf32>
    %103 = arith.addf %101, %102 : vector<8x64xf32>
    %104 = math.tanh %103 : vector<8x64xf32>
    %105 = arith.truncf %104 : vector<8x64xf32> to vector<8x64xbf16>
    %cst_22 = arith.constant dense<0.000000e+00> : vector<8x80xf32>
    %106 = tpu.matmul %105, %2, %cst_22 {dimension_numbers = #tpu.dot_dimension_numbers<[1], [0], [0], [1], [0, 0, 1, 1], [], []>} : vector<8x64xbf16>, vector<64x80xbf16>, vector<8x80xf32> -> vector<8x80xf32>
    %107 = vector.extract_strided_slice %106 {offsets = [0, 0], sizes = [8, 64], strides = [1, 1]} : vector<8x80xf32> to vector<8x64xf32>
    %108 = arith.addf %96, %107 : vector<8x64xf32>
    %109 = vector.broadcast %6 : vector<1x64xf32> to vector<8x64xf32>
    %110 = arith.addf %108, %109 : vector<8x64xf32>
    %111 = vector.extract_strided_slice %106 {offsets = [0, 64], sizes = [8, 16], strides = [1, 1]} : vector<8x80xf32> to vector<8x16xf32>
    %112 = arith.addf %98, %111 : vector<8x16xf32>
    %113 = arith.addf %9, %112 : vector<8x16xf32>
    %114 = vector.broadcast %7 : vector<1x16xf32> to vector<8x16xf32>
    %115 = arith.addf %113, %114 : vector<8x16xf32>
    %c0_23 = arith.constant 0 : index
    %c0_24 = arith.constant 0 : index
    %116 = vector.load %arg5[%c0_23, %c0_24] : memref<8x16xf32, #tpu.memory_space<vmem>>, vector<8x16xf32>
    tpu.vector_store %arg5[%c0_23, %c0_24], %115 {strides = array<i32>} : memref<8x16xf32, #tpu.memory_space<vmem>>, vector<8x16xf32>,
    return
  }
  func.func @transform_0(%arg0: i32) -> (i32, i32) {
    %c0_i32 = arith.constant 0 : i32
    %c0_i32_0 = arith.constant 0 : i32
    return %arg0, %c0_i32 : i32, i32
  }
  func.func @transform_1(%arg0: i32) -> (i32, i32) {
    %c0_i32 = arith.constant 0 : i32
    %c0_i32_0 = arith.constant 0 : i32
    %c0_i32_1 = arith.constant 0 : i32
    return %c0_i32, %c0_i32_0 : i32, i32
  }
  func.func @transform_2(%arg0: i32) -> (i32, i32) {
    %c0_i32 = arith.constant 0 : i32
    %c0_i32_0 = arith.constant 0 : i32
    %c0_i32_1 = arith.constant 0 : i32
    return %c0_i32, %c0_i32_0 : i32, i32
  }
  func.func @transform_3(%arg0: i32) -> (i32, i32) {
    %c0_i32 = arith.constant 0 : i32
    %c0_i32_0 = arith.constant 0 : i32
    %c0_i32_1 = arith.constant 0 : i32
    return %c0_i32, %c0_i32_0 : i32, i32
  }
  func.func @transform_4(%arg0: i32) -> (i32, i32) {
    %c0_i32 = arith.constant 0 : i32
    %c0_i32_0 = arith.constant 0 : i32
    return %arg0, %c0_i32 : i32, i32
  }
}

</mosaic_0001>

<bundles_post_ra>
// kernel: tpu_custom_call.1
= control target key start
LH: loop header
LB: loop body
LE: loop exit
PB: predicated region body
PF: predicated region fallthrough
CT: control target
= control target key end

     0   :  { %v1187_v1 = vmov 0.0   ;;  %vm1188_vm0 = vmmov 0   ;;  %s1476_s0 = inlined_call_operand.vmem [shape: f32[8,48], index: 0, kind: input, shape index: {}]   ;;  %s1477_s1 = inlined_call_operand.vmem [shape: bf16[112,64], index: 1, kind: input, shape index: {}]   ;;  %s1478_s2 = inlined_call_operand.vmem [shape: bf16[64,80], index: 2, kind: input, shape index: {}]   ;;  %s1479_s3 = inlined_call_operand.vmem [shape: f32[8,64], index: 3, kind: input, shape index: {}]   ;;  %s1480_s4 = inlined_call_operand.hbm [shape: f32[8,16], index: 4, kind: output, shape index: {}]  }
   0x1   :  { %v1124_v0 = vld [vmem:[%s1477_s1] sm:$0xff]   ;;  %942 = vmatprep.subr.bf16.mxu0 %v1187_v1  ;;  %952 = vmatprep.subr.bf16.mxu1 %v1187_v1  ;;  %v1125_v2 = vld [vmem:[%s1477_s1 + $0x8] sm:$0xff]   ;;  %v1126_v3 = vld [vmem:[%s1477_s1 + $0x10] sm:$0xff]  }
   0x2   :  { %943 = vmatpush3.bf16.msra.mxu0 %v1124_v0  ;;  %948 = vmatprep.mubr.msk.bf16.mxu0 %vm1188_vm0, %v1187_v1  ;;  %v1235_v4 = vld [vmem:[%s1476_s0] sm:$0xff] }
   0x3   :  { %944 = vmatprep.subr.bf16.mxu0 %v1187_v1  ;;  %960 = vmatprep.mubr.msk.bf16.mxu1 %vm1188_vm0, %v1187_v1  ;;  %v43_v5 = vpack.c.bf16 %v1235_v4, %v1235_v4 }
   0x6   :  { %945 = vmatpush3.bf16.msra.mxu0 %v1125_v2 }
   0x7   :  { %946 = vmatprep.subr.bf16.mxu0 %v1187_v1 }
   0x8   :  { %9 = vsyncpa [#allocation3], 0  ;;  %vm66_vm1 = vcmask 392192   ;;  %v1246_v6 = vld [vmem:[%s1477_s1 + $0x18] sm:$0xff]   ;;  %v1253_v7 = vld [vmem:[%s1477_s1 + $0x20] sm:$0xff]   ;;  %v44_v10 = vlaneseq  ;;  %vm140_vm2 = vcmask 523264  }
   0x9   :  { %953 = vmatpush3.bf16.msra.mxu1 %v1246_v6  ;;  %v1260_v8 = vld [vmem:[%s1477_s1 + $0x28] sm:$0xff]   ;;  %v1267_v9 = vld [vmem:[%s1477_s1 + $0x30] sm:$0xff]   ;;  %v1277_v13 = vld [vmem:[%s1479_s3] sm:$0xff]  ;;  %s1190_s12 = smov [#allocation2]   ;;  %vm826_vm3 = vcmask 130048  }
   0xa   :  { %947 = vmatpush3.bf16.msra.mxu0 %v1126_v3  ;;  %954 = vmatprep.subr.bf16.mxu1 %v1187_v1  ;;  %v1271_v11 = vshrl.u32 %v44_v10, 7  ;;  %v1294_v22 = vld [vmem:[%s1478_s2] sm:$0xff]   ;;  %v1301_v23 = vld [vmem:[%s1478_s2 + $0x8] sm:$0xff]   ;;  %v1308_v24 = vld [vmem:[%s1478_s2 + $0x10] sm:$0xff]   ;;  %s834_s13 = sshll.u32 %s1190_s12, 4  ;;  %s835_s13 = int_to_ptr.vmem [resolvable:$true] %s834_s13 }
   0xb   :  { %964 = vmatprep.subr.bf16.mxu0 %v1187_v1  ;;  %v1315_v25 = vld [vmem:[%s1478_s2 + $0x18] sm:$0xff]   ;;  %s1189_s2 = smov 64   ;;  %s1163_s14 = scalar_lea.vmem %s835_s13, 128 }
   0xc   :  { %v46_v12 = vsub.s32 0, %v1271_v11  ;;  %v114_v26 = vsub.s32 1, %v1271_v11  ;;  %v256_v35 = vsub.s32 2, %v1271_v11  ;;  %p1164_p0 = scmp.ne.s32.totalorder %s835_s13, %s1163_s14  ;;  %p1168_p1 = scmp.lt.s32.totalorder %s835_s13, %s835_s13 }
   0xd   :  { %949 = vmatmul.mubr.msk.bf16.vlgmr.msra.gmra.mrb[0].mxu0 %vm66_vm1, %v43_v5  ;;  %955 = vmatpush3.bf16.msra.mxu1 %v1253_v7  ;;  %p1169_p2 = scmp.lt.s32.totalorder %s1163_s14, %s1163_s14 }
   0xe   :  { %972 = vmatprep.mubr.msk.bf16.mxu0 %vm1188_vm0, %v1187_v1  ;;  %956 = vmatprep.subr.bf16.mxu1 %v1187_v1  ;;  %v47_v14 = vrot.slane %v1277_v13, %v46_v12  ;;  %v1321_v27 = vrot.slane %v1277_v13, %v114_v26  ;;  %v1337_v36 = vrot.slane %v1277_v13, %v256_v35 }
   0xf   :  { %965 = vmatpush3.bf16.msra.mxu0 %v1294_v22  ;;  %p1170_p3 = por %p1169_p2, %p1168_p1 }
  0x10   :  { %966 = vmatprep.subr.bf16.mxu0 %v1187_v1 }
  0x11   :  { %957 = vmatpush3.bf16.msra.mxu1 %v1260_v8  ;;  %p1171_p4 = pnand %p1170_p3, %p1164_p0 }
  0x12   :  { %958 = vmatprep.subr.bf16.mxu1 %v1187_v1 }
  0x13   :  { %967 = vmatpush3.bf16.msra.mxu0 %v1301_v23 }
  0x14   :  { %968 = vmatprep.subr.bf16.mxu0 %v1187_v1 }
  0x15   :  { %959 = vmatpush3.bf16.msra.mxu1 %v1267_v9 }
  0x16   :  { %976 = vmatprep.subr.bf16.mxu1 %v1187_v1 }
  0x17   :  { %969 = vmatpush3.bf16.msra.mxu0 %v1308_v24 }
  0x18   :  { %970 = vmatprep.subr.bf16.mxu0 %v1187_v1 }
  0x1b   :  { %971 = vmatpush3.bf16.msra.mxu0 %v1315_v25 }
  0x1c   :  { %988 = vmatprep.subr.bf16.mxu0 %v1187_v1 }
  0xe0   :  { %v104_v15 = vpop.f32.mrb[0].mxu0 }
  0xe1   :  { %v105_v16 = vadd.f32 %v104_v15, %v47_v14  ;;  %v950_v17 = vpop.f32.mrb[1].mxu0 }
  0xe2   :  { %v107_v18 = vpop.f32.mrb[2].mxu0 }
  0xe3   :  { %1135 = vtanh.f32 %v105_v16  ;;  %v951_v19 = vpop.f32.mrb[3].mxu0 }
  0xed   :  { %v1136_v20 = vpop.eup %1135 }
  0xee   :  { %v111_v21 = vpack.c.bf16 %v1136_v20, %v1136_v20 }
  0xf0   :  { %961 = vmatmul.mubr.msk.bf16.vlgmr.msra.gmra.mrb[0].mxu1 %vm140_vm2, %v111_v21 }
  0xf1   :  { %977 = vmatpush3.bf16.msra.mxu1 %v1246_v6  ;;  %984 = vmatprep.mubr.msk.bf16.mxu1 %vm1188_vm0, %v1187_v1 }
  0xf2   :  { %978 = vmatprep.subr.bf16.mxu1 %v1187_v1 }
  0xf5   :  { %979 = vmatpush3.bf16.msra.mxu1 %v1253_v7 }
  0xf6   :  { %980 = vmatprep.subr.bf16.mxu1 %v1187_v1 }
  0xf9   :  { %981 = vmatpush3.bf16.msra.mxu1 %v1260_v8 }
  0xfa   :  { %982 = vmatprep.subr.bf16.mxu1 %v1187_v1 }
  0xfd   :  { %983 = vmatpush3.bf16.msra.mxu1 %v1267_v9 }
  0xfe   :  { %1000 = vmatprep.subr.bf16.mxu1 %v1187_v1 }
 0x1c3   :  { %v178_v28 = vpop.f32.mrb[0].mxu1 }
 0x1c4   :  { %v179_v29 = vadd.f32 %v178_v28, %v1321_v27  ;;  %v962_v30 = vpop.f32.mrb[1].mxu1 }
 0x1c5   :  { %v181_v31 = vpop.f32.mrb[2].mxu1 }
 0x1c6   :  { %1137 = vtanh.f32 %v179_v29  ;;  %v963_v32 = vpop.f32.mrb[3].mxu1 }
 0x1d0   :  { %v1138_v33 = vpop.eup %1137 }
 0x1d1   :  { %v185_v34 = vpack.c.bf16 %v1138_v33, %v1138_v33 }
 0x1d3   :  { %973 = vmatmul.mubr.msk.bf16.vlgmr.msra.gmra.mrb[4].mxu0 %vm140_vm2, %v185_v34 }
 0x1d4   :  { %989 = vmatpush3.bf16.msra.mxu0 %v1294_v22  ;;  %996 = vmatprep.mubr.msk.bf16.mxu0 %vm1188_vm0, %v1187_v1 }
 0x1d5   :  { %990 = vmatprep.subr.bf16.mxu0 %v1187_v1 }
 0x1d8   :  { %991 = vmatpush3.bf16.msra.mxu0 %v1301_v23 }
 0x1d9   :  { %992 = vmatprep.subr.bf16.mxu0 %v1187_v1 }
 0x1dc   :  { %993 = vmatpush3.bf16.msra.mxu0 %v1308_v24 }
 0x1dd   :  { %994 = vmatprep.subr.bf16.mxu0 %v1187_v1 }
 0x1e0   :  { %995 = vmatpush3.bf16.msra.mxu0 %v1315_v25 }
 0x1e1   :  { %1012 = vmatprep.subr.bf16.mxu0 %v1187_v1 }
 0x2a6   :  { %v247_v37 = vpop.f32.mrb[4].mxu0 }
 0x2a7   :  { %v253_v38 = vadd.f32 %v247_v37, %v105_v16  ;;  %v974_v39 = vpop.f32.mrb[5].mxu0 }
 0x2a8   :  { %v250_v40 = vpop.f32.mrb[6].mxu0 }
 0x2a9   :  { %v258_v41 = vadd.f32 %v1337_v36, %v253_v38  ;;  %v975_v42 = vpop.f32.mrb[7].mxu0 }
 0x2ab   :  { %1139 = vtanh.f32 %v258_v41 }
 0x2b5   :  { %v1140_v43 = vpop.eup %1139 }
 0x2b6   :  { %v261_v44 = vpack.c.bf16 %v1140_v43, %v1140_v43 }
 0x2b8   :  { %985 = vmatmul.mubr.msk.bf16.vlgmr.msra.gmra.mrb[4].mxu1 %vm140_vm2, %v261_v44 }
 0x2b9   :  { %1001 = vmatpush3.bf16.msra.mxu1 %v1246_v6  ;;  %1008 = vmatprep.mubr.msk.bf16.mxu1 %vm1188_vm0, %v1187_v1 }
 0x2ba   :  { %1002 = vmatprep.subr.bf16.mxu1 %v1187_v1 }
 0x2bd   :  { %1003 = vmatpush3.bf16.msra.mxu1 %v1253_v7 }
 0x2be   :  { %1004 = vmatprep.subr.bf16.mxu1 %v1187_v1 }
 0x2c1   :  { %1005 = vmatpush3.bf16.msra.mxu1 %v1260_v8 }
 0x2c2   :  { %1006 = vmatprep.subr.bf16.mxu1 %v1187_v1 }
 0x2c5   :  { %1007 = vmatpush3.bf16.msra.mxu1 %v1267_v9 }
 0x2c6   :  { %1024 = vmatprep.subr.bf16.mxu1 %v1187_v1 }
 0x38b   :  { %v299_v45 = vpop.f32.mrb[4].mxu1 }
 0x38c   :  { %v300_v46 = vadd.f32 %v299_v45, %v1321_v27  ;;  %v986_v47 = vpop.f32.mrb[5].mxu1 }
 0x38d   :  { %v302_v48 = vpop.f32.mrb[6].mxu1 }
 0x38e   :  { %1141 = vtanh.f32 %v300_v46  ;;  %v987_v49 = vpop.f32.mrb[7].mxu1 }
 0x398   :  { %v1142_v50 = vpop.eup %1141 }
 0x399   :  { %v306_v51 = vpack.c.bf16 %v1142_v50, %v1142_v50 }
 0x39b   :  { %997 = vmatmul.mubr.msk.bf16.vlgmr.msra.gmra.mrb[8].mxu0 %vm140_vm2, %v306_v51 }
 0x39c   :  { %1013 = vmatpush3.bf16.msra.mxu0 %v1294_v22  ;;  %1020 = vmatprep.mubr.msk.bf16.mxu0 %vm1188_vm0, %v1187_v1 }
 0x39d   :  { %1014 = vmatprep.subr.bf16.mxu0 %v1187_v1 }
 0x3a0   :  { %1015 = vmatpush3.bf16.msra.mxu0 %v1301_v23 }
 0x3a1   :  { %1016 = vmatprep.subr.bf16.mxu0 %v1187_v1 }
 0x3a4   :  { %1017 = vmatpush3.bf16.msra.mxu0 %v1308_v24 }
 0x3a5   :  { %1018 = vmatprep.subr.bf16.mxu0 %v1187_v1 }
 0x3a8   :  { %1019 = vmatpush3.bf16.msra.mxu0 %v1315_v25 }
 0x3a9   :  { %1036 = vmatprep.subr.bf16.mxu0 %v1187_v1 }
 0x46e   :  { %v344_v52 = vpop.f32.mrb[8].mxu0 }
 0x46f   :  { %v350_v53 = vadd.f32 %v344_v52, %v258_v41  ;;  %v352_v54 = vadd.f32 %v344_v52, %v247_v37  ;;  %v998_v55 = vpop.f32.mrb[9].mxu0 }
 0x470   :  { %v347_v56 = vpop.f32.mrb[10].mxu0 }
 0x471   :  { %v351_v57 = vadd.f32 %v350_v53, %v1337_v36  ;;  %v999_v58 = vpop.f32.mrb[11].mxu0 }
 0x473   :  { %1143 = vtanh.f32 %v351_v57 }
 0x47d   :  { %v1144_v59 = vpop.eup %1143 }
 0x47e   :  { %v354_v60 = vpack.c.bf16 %v1144_v59, %v1144_v59 }
 0x480   :  { %1009 = vmatmul.mubr.msk.bf16.vlgmr.msra.gmra.mrb[8].mxu1 %vm140_vm2, %v354_v60 }
 0x481   :  { %1025 = vmatpush3.bf16.msra.mxu1 %v1246_v6  ;;  %1032 = vmatprep.mubr.msk.bf16.mxu1 %vm1188_vm0, %v1187_v1 }
 0x482   :  { %1026 = vmatprep.subr.bf16.mxu1 %v1187_v1 }
 0x485   :  { %1027 = vmatpush3.bf16.msra.mxu1 %v1253_v7 }
 0x486   :  { %1028 = vmatprep.subr.bf16.mxu1 %v1187_v1 }
 0x489   :  { %1029 = vmatpush3.bf16.msra.mxu1 %v1260_v8 }
 0x48a   :  { %1030 = vmatprep.subr.bf16.mxu1 %v1187_v1 }
 0x48d   :  { %1031 = vmatpush3.bf16.msra.mxu1 %v1267_v9 }
 0x48e   :  { %1048 = vmatprep.subr.bf16.mxu1 %v1187_v1 }
 0x553   :  { %v392_v61 = vpop.f32.mrb[8].mxu1 }
 0x554   :  { %v393_v62 = vadd.f32 %v392_v61, %v1321_v27  ;;  %v1010_v63 = vpop.f32.mrb[9].mxu1 }
 0x555   :  { %v395_v0 = vpop.f32.mrb[10].mxu1 }
 0x556   :  { %1145 = vtanh.f32 %v393_v62  ;;  %v1011_v2 = vpop.f32.mrb[11].mxu1 }
 0x560   :  { %v1146_v3 = vpop.eup %1145 }
 0x561   :  { %v399_v5 = vpack.c.bf16 %v1146_v3, %v1146_v3 }
 0x563   :  { %1021 = vmatmul.mubr.msk.bf16.vlgmr.msra.gmra.mrb[12].mxu0 %vm140_vm2, %v399_v5 }
 0x564   :  { %1037 = vmatpush3.bf16.msra.mxu0 %v1294_v22  ;;  %1044 = vmatprep.mubr.msk.bf16.mxu0 %vm1188_vm0, %v1187_v1 }
 0x565   :  { %1038 = vmatprep.subr.bf16.mxu0 %v1187_v1 }
 0x568   :  { %1039 = vmatpush3.bf16.msra.mxu0 %v1301_v23 }
 0x569   :  { %1040 = vmatprep.subr.bf16.mxu0 %v1187_v1 }
 0x56c   :  { %1041 = vmatpush3.bf16.msra.mxu0 %v1308_v24 }
 0x56d   :  { %1042 = vmatprep.subr.bf16.mxu0 %v1187_v1 }
 0x570   :  { %1043 = vmatpush3.bf16.msra.mxu0 %v1315_v25 }
 0x571   :  { %1060 = vmatprep.subr.bf16.mxu0 %v1187_v1 }
 0x636   :  { %v437_v10 = vpop.f32.mrb[12].mxu0 }
 0x637   :  { %v443_v12 = vadd.f32 %v437_v10, %v351_v57  ;;  %v445_v14 = vadd.f32 %v437_v10, %v352_v54  ;;  %v1022_v15 = vpop.f32.mrb[13].mxu0 }
 0x638   :  { %v440_v16 = vpop.f32.mrb[14].mxu0 }
 0x639   :  { %v444_v17 = vadd.f32 %v443_v12, %v1337_v36  ;;  %v1023_v18 = vpop.f32.mrb[15].mxu0 }
 0x63b   :  { %1147 = vtanh.f32 %v444_v17 }
 0x645   :  { %v1148_v19 = vpop.eup %1147 }
 0x646   :  { %v447_v20 = vpack.c.bf16 %v1148_v19, %v1148_v19 }
 0x648   :  { %1033 = vmatmul.mubr.msk.bf16.vlgmr.msra.gmra.mrb[12].mxu1 %vm140_vm2, %v447_v20 }
 0x649   :  { %1049 = vmatpush3.bf16.msra.mxu1 %v1246_v6  ;;  %1056 = vmatprep.mubr.msk.bf16.mxu1 %vm1188_vm0, %v1187_v1 }
 0x64a   :  { %1050 = vmatprep.subr.bf16.mxu1 %v1187_v1 }
 0x64d   :  { %1051 = vmatpush3.bf16.msra.mxu1 %v1253_v7 }
 0x64e   :  { %1052 = vmatprep.subr.bf16.mxu1 %v1187_v1 }
 0x651   :  { %1053 = vmatpush3.bf16.msra.mxu1 %v1260_v8 }
 0x652   :  { %1054 = vmatprep.subr.bf16.mxu1 %v1187_v1 }
 0x655   :  { %1055 = vmatpush3.bf16.msra.mxu1 %v1267_v9 }
 0x656   :  { %1072 = vmatprep.subr.bf16.mxu1 %v1187_v1 }
 0x71b   :  { %v485_v21 = vpop.f32.mrb[12].mxu1 }
 0x71c   :  { %v486_v26 = vadd.f32 %v485_v21, %v1321_v27  ;;  %v1034_v28 = vpop.f32.mrb[13].mxu1  ;;  %v823_v21 = vsub.s32 3, %v1271_v11 }
 0x71d   :  { %v488_v29 = vpop.f32.mrb[14].mxu1 }
 0x71e   :  { %1149 = vtanh.f32 %v486_v26  ;;  %v1035_v30 = vpop.f32.mrb[15].mxu1  ;;  %v824_v26 = vrot.slane %v1277_v13, %v823_v21 }
 0x728   :  { %v1150_v31 = vpop.eup %1149 }
 0x729   :  { %v492_v32 = vpack.c.bf16 %v1150_v31, %v1150_v31 }
 0x72b   :  { %1045 = vmatmul.mubr.msk.bf16.vlgmr.msra.gmra.mrb[16].mxu0 %vm140_vm2, %v492_v32 }
 0x72c   :  { %1061 = vmatpush3.bf16.msra.mxu0 %v1294_v22  ;;  %1068 = vmatprep.mubr.msk.bf16.mxu0 %vm1188_vm0, %v1187_v1 }
 0x72d   :  { %1062 = vmatprep.subr.bf16.mxu0 %v1187_v1 }
 0x730   :  { %1063 = vmatpush3.bf16.msra.mxu0 %v1301_v23 }
 0x731   :  { %1064 = vmatprep.subr.bf16.mxu0 %v1187_v1 }
 0x734   :  { %1065 = vmatpush3.bf16.msra.mxu0 %v1308_v24 }
 0x735   :  { %1066 = vmatprep.subr.bf16.mxu0 %v1187_v1 }
 0x738   :  { %1067 = vmatpush3.bf16.msra.mxu0 %v1315_v25 }
 0x739   :  { %1084 = vmatprep.subr.bf16.mxu0 %v1187_v1 }
 0x7fe   :  { %v530_v33 = vpop.f32.mrb[16].mxu0 }
 0x7ff   :  { %v536_v34 = vadd.f32 %v530_v33, %v444_v17  ;;  %v538_v35 = vadd.f32 %v530_v33, %v445_v14  ;;  %v1046_v37 = vpop.f32.mrb[17].mxu0 }
 0x800   :  { %v533_v38 = vpop.f32.mrb[18].mxu0 }
 0x801   :  { %v537_v39 = vadd.f32 %v536_v34, %v1337_v36  ;;  %v1047_v40 = vpop.f32.mrb[19].mxu0 }
 0x803   :  { %1151 = vtanh.f32 %v537_v39 }
 0x80d   :  { %v1152_v41 = vpop.eup %1151 }
 0x80e   :  { %v540_v42 = vpack.c.bf16 %v1152_v41, %v1152_v41 }
 0x810   :  { %1057 = vmatmul.mubr.msk.bf16.vlgmr.msra.gmra.mrb[16].mxu1 %vm140_vm2, %v540_v42 }
 0x811   :  { %1073 = vmatpush3.bf16.msra.mxu1 %v1246_v6  ;;  %1080 = vmatprep.mubr.msk.bf16.mxu1 %vm1188_vm0, %v1187_v1 }
 0x812   :  { %1074 = vmatprep.subr.bf16.mxu1 %v1187_v1 }
 0x815   :  { %1075 = vmatpush3.bf16.msra.mxu1 %v1253_v7 }
 0x816   :  { %1076 = vmatprep.subr.bf16.mxu1 %v1187_v1 }
 0x819   :  { %1077 = vmatpush3.bf16.msra.mxu1 %v1260_v8 }
 0x81a   :  { %1078 = vmatprep.subr.bf16.mxu1 %v1187_v1 }
 0x81d   :  { %1079 = vmatpush3.bf16.msra.mxu1 %v1267_v9 }
 0x81e   :  { %1096 = vmatprep.subr.bf16.mxu1 %v1187_v1 }
 0x8e3   :  { %v578_v43 = vpop.f32.mrb[16].mxu1 }
 0x8e4   :  { %v579_v44 = vadd.f32 %v578_v43, %v1321_v27  ;;  %v1058_v45 = vpop.f32.mrb[17].mxu1 }
 0x8e5   :  { %v581_v46 = vpop.f32.mrb[18].mxu1 }
 0x8e6   :  { %1153 = vtanh.f32 %v579_v44  ;;  %v1059_v47 = vpop.f32.mrb[19].mxu1 }
 0x8f0   :  { %v1154_v48 = vpop.eup %1153 }
 0x8f1   :  { %v585_v49 = vpack.c.bf16 %v1154_v48, %v1154_v48 }
 0x8f3   :  { %1069 = vmatmul.mubr.msk.bf16.vlgmr.msra.gmra.mrb[20].mxu0 %vm140_vm2, %v585_v49 }
 0x8f4   :  { %1085 = vmatpush3.bf16.msra.mxu0 %v1294_v22  ;;  %1092 = vmatprep.mubr.msk.bf16.mxu0 %vm1188_vm0, %v1187_v1 }
 0x8f5   :  { %1086 = vmatprep.subr.bf16.mxu0 %v1187_v1 }
 0x8f8   :  { %1087 = vmatpush3.bf16.msra.mxu0 %v1301_v23 }
 0x8f9   :  { %1088 = vmatprep.subr.bf16.mxu0 %v1187_v1 }
 0x8fc   :  { %1089 = vmatpush3.bf16.msra.mxu0 %v1308_v24 }
 0x8fd   :  { %1090 = vmatprep.subr.bf16.mxu0 %v1187_v1 }
 0x900   :  { %1091 = vmatpush3.bf16.msra.mxu0 %v1315_v25 }
 0x901   :  { %1108 = vmatprep.subr.bf16.mxu0 %v1187_v1 }
 0x9c6   :  { %v623_v50 = vpop.f32.mrb[20].mxu0 }
 0x9c7   :  { %v629_v51 = vadd.f32 %v623_v50, %v537_v39  ;;  %v631_v52 = vadd.f32 %v623_v50, %v538_v35  ;;  %v1070_v53 = vpop.f32.mrb[21].mxu0 }
 0x9c8   :  { %v626_v54 = vpop.f32.mrb[22].mxu0 }
 0x9c9   :  { %v630_v55 = vadd.f32 %v629_v51, %v1337_v36  ;;  %v1071_v56 = vpop.f32.mrb[23].mxu0 }
 0x9cb   :  { %1155 = vtanh.f32 %v630_v55 }
 0x9d5   :  { %v1156_v57 = vpop.eup %1155 }
 0x9d6   :  { %v633_v58 = vpack.c.bf16 %v1156_v57, %v1156_v57 }
 0x9d8   :  { %1081 = vmatmul.mubr.msk.bf16.vlgmr.msra.gmra.mrb[20].mxu1 %vm140_vm2, %v633_v58 }
 0x9d9   :  { %1097 = vmatpush3.bf16.msra.mxu1 %v1246_v6  ;;  %1104 = vmatprep.mubr.msk.bf16.mxu1 %vm1188_vm0, %v1187_v1 }
 0x9da   :  { %1098 = vmatprep.subr.bf16.mxu1 %v1187_v1 }
 0x9dd   :  { %1099 = vmatpush3.bf16.msra.mxu1 %v1253_v7 }
 0x9de   :  { %1100 = vmatprep.subr.bf16.mxu1 %v1187_v1 }
 0x9e1   :  { %1101 = vmatpush3.bf16.msra.mxu1 %v1260_v8 }
 0x9e2   :  { %1102 = vmatprep.subr.bf16.mxu1 %v1187_v1 }
 0x9e5   :  { %1103 = vmatpush3.bf16.msra.mxu1 %v1267_v9 }
 0xaab   :  { %v671_v59 = vpop.f32.mrb[20].mxu1 }
 0xaac   :  { %v672_v60 = vadd.f32 %v671_v59, %v1321_v27  ;;  %v1082_v61 = vpop.f32.mrb[21].mxu1 }
 0xaad   :  { %v674_v6 = vpop.f32.mrb[22].mxu1 }
 0xaae   :  { %1157 = vtanh.f32 %v672_v60  ;;  %v1083_v62 = vpop.f32.mrb[23].mxu1 }
 0xab8   :  { %v1158_v63 = vpop.eup %1157 }
 0xab9   :  { %v678_v0 = vpack.c.bf16 %v1158_v63, %v1158_v63 }
 0xabb   :  { %1093 = vmatmul.mubr.msk.bf16.vlgmr.msra.gmra.mrb[24].mxu0 %vm140_vm2, %v678_v0 }
 0xabc   :  { %1109 = vmatpush3.bf16.msra.mxu0 %v1294_v22  ;;  %1116 = vmatprep.mubr.msk.bf16.mxu0 %vm1188_vm0, %v1187_v1 }
 0xabd   :  { %1110 = vmatprep.subr.bf16.mxu0 %v1187_v1 }
 0xac0   :  { %1111 = vmatpush3.bf16.msra.mxu0 %v1301_v23 }
 0xac1   :  { %1112 = vmatprep.subr.bf16.mxu0 %v1187_v1 }
 0xac4   :  { %1113 = vmatpush3.bf16.msra.mxu0 %v1308_v24 }
 0xac5   :  { %1114 = vmatprep.subr.bf16.mxu0 %v1187_v1 }
 0xac8   :  { %1115 = vmatpush3.bf16.msra.mxu0 %v1315_v25 }
 0xb8e   :  { %v716_v7 = vpop.f32.mrb[24].mxu0 }
 0xb8f   :  { %v722_v8 = vadd.f32 %v716_v7, %v630_v55  ;;  %v724_v9 = vadd.f32 %v716_v7, %v631_v52  ;;  %v1094_v2 = vpop.f32.mrb[25].mxu0 }
 0xb90   :  { %v719_v22 = vpop.f32.mrb[26].mxu0 }
 0xb91   :  { %v723_v3 = vadd.f32 %v722_v8, %v1337_v36  ;;  %v1095_v5 = vpop.f32.mrb[27].mxu0 }
 0xb93   :  { %1159 = vtanh.f32 %v723_v3 }
 0xb9d   :  { %v1160_v10 = vpop.eup %1159 }
 0xb9e   :  { %v726_v12 = vpack.c.bf16 %v1160_v10, %v1160_v10 }
 0xba0   :  { %1105 = vmatmul.mubr.msk.bf16.vlgmr.msra.gmra.mrb[24].mxu1 %vm140_vm2, %v726_v12 }
 0xc73   :  { %v764_v23 = vpop.f32.mrb[24].mxu1 }
 0xc74   :  { %v765_v24 = vadd.f32 %v764_v23, %v1321_v27  ;;  %v1106_v14 = vpop.f32.mrb[25].mxu1 }
 0xc75   :  { %v767_v1 = vpop.f32.mrb[26].mxu1 }
 0xc76   :  { %1161 = vtanh.f32 %v765_v24  ;;  %v1107_v25 = vpop.f32.mrb[27].mxu1 }
 0xc80   :  { %v1162_v15 = vpop.eup %1161 }
 0xc81   :  { %v771_v16 = vpack.c.bf16 %v1162_v15, %v1162_v15 }
 0xc83   :  { %1117 = vmatmul.mubr.msk.bf16.vlgmr.msra.gmra.mrb[28].mxu0 %vm140_vm2, %v771_v16 }
 0xd56   :  { %v809_v17 = vpop.f32.mrb[28].mxu0 }
 0xd57   :  { %v815_v18 = vadd.f32 %v809_v17, %v724_v9  ;;  %v1118_v36 = vpop.f32.mrb[29].mxu0 }
 0xd58   :  { %v812_v19 = vpop.f32.mrb[30].mxu0 }
 0xd59   :  { %v1119_v20 = vpop.f32.mrb[31].mxu0  ;;  %817 = vrot.lane.b32.xlu0 %v815_v18, %s1189_s2 }
 0xdcb   :  { %v818_v27 = vpop.permute.xlu0 %817 }
 0xdcc   :  { %v820_v28 = vadd.f32 %v818_v27, %v1235_v4 }
 0xdce   :  { %v825_v29 = vadd.f32 %v824_v26, %v820_v28 }
 0xdd0   :  { %827 = vst.msk [vmem:[#allocation2] sm:$0xff] %vm826_vm3, %v825_v29 }
 0xdd1   :  { %1174 = shalt.err (!%p1171_p4)
}
 0xdd2   :  { %s1175_s17 = scalar_lea.hbm %s1480_s4, 128 }
 0xdd3   :  { %p1176_p5 = scmp.ne.s32.totalorder %s1480_s4, %s1175_s17  ;;  %p1179_p6 = scmp.lt.u32.totalorder %s1175_s17, %s1480_s4 }
 0xdd5   :  { %p1181_p7 = pnand %p1179_p6, %p1176_p5 }
 0xdd7   :  { %1184 = shalt.err (!%p1181_p7)
}
 0xdd8   :  { %837 = dma.vmem_to_hbm [thread:$0]  %s835_s13, 128, %s1480_s4, [#allocation3]  }
 0xdd9   :  { %1185 = dma.done.wait [#allocation3], 128  }
 0xdda   :  { %1186 = vsyncadd [#allocation3], 4294967168 }
 0xddb   :  { %841 = vsyncpa [#allocation3], 1 }

</bundles_post_ra>
